<compile_context>
chip_gen: v5e
topology: v5e:2x2
jax: 0.10.0
libtpu: 0.0.40
codegen_flags: <defaults>
</compile_context>

<pallas_src>
import functools

import jax
import jax.numpy as jnp
from jax.experimental import pallas as pl
from jax.experimental.pallas import tpu as pltpu

LANE = 128


def _round_up(n, m):
    return ((n + m - 1) // m) * m


def mlp_kernel(x_ref,
               w1_ref, b1_ref,
               w2_ref, b2_ref,
               w3_ref, b3_ref,
               w4_ref, b4_ref,
               w5_ref, b5_ref,
               o_ref, *, out_dim):
    # Cast the f32 input tile to bf16 in-kernel (saves a wrapper HBM pass).
    h = x_ref[...].astype(jnp.bfloat16)

    # Hidden layers: bf16 MXU matmul with f32 accumulation; bias + ReLU on the VPU.
    for w_ref, b_ref in ((w1_ref, b1_ref), (w2_ref, b2_ref),
                         (w3_ref, b3_ref), (w4_ref, b4_ref)):
        y = jnp.dot(h, w_ref[...], preferred_element_type=jnp.float32)
        y = jnp.maximum(y + b_ref[...], 0.0)
        # TODO(synk): training-mode dropout (stochastic masking) not implemented; eval mode = identity.
        h = y.astype(jnp.bfloat16)

    # Final linear (no ReLU).
    logits = jnp.dot(h, w5_ref[...], preferred_element_type=jnp.float32) + b5_ref[...]

    # Mask the lane-padded output columns so softmax matches the unpadded module.
    col = jax.lax.broadcasted_iota(jnp.int32, logits.shape, 1)
    logits = jnp.where(col < out_dim, logits, -jnp.inf)

    # Numerically stable softmax over features (== PyTorch Softmax(dim=1) on 2-D input).
    m = jnp.max(logits, axis=-1, keepdims=True)
    e = jnp.exp(logits - m)
    denom = jnp.sum(e, axis=-1, keepdims=True)
    o_ref[...] = (e / denom).astype(o_ref.dtype)   # exact reciprocal: rows sum to 1


def pad_params(params, input_size):
    """One-time prep: zero-pad every layer's output dim to a 128-lane multiple.

    Weights -> bf16 (halves resident VMEM + DMA), biases stay f32.
    The first layer's K dim stays at `input_size` (input is not lane-padded).
    """
    dims = [input_size] + [w.shape[1] for w, _ in params]
    dims_p = [input_size] + [_round_up(d, LANE) for d in dims[1:]]
    padded = []
    for li, (w, b) in enumerate(params):
        kp, npad = dims_p[li], dims_p[li + 1]
        wp = jnp.zeros((kp, npad), jnp.bfloat16).at[:w.shape[0], :w.shape[1]].set(
            w.astype(jnp.bfloat16))
        bp = jnp.zeros((1, npad), jnp.float32).at[:, :b.shape[0]].set(
            b.reshape(1, -1).astype(jnp.float32))
        padded += [wp, bp]
    return padded, dims_p


def _choose_tile_b(B, tile_b):
    tile_b = max(8, tile_b)
    if B <= tile_b:
        # Single tile covers the whole (small) batch.
        return _round_up(B, 8)
    # >=2 grid steps (lets "parallel" shard across v7x's two TensorCores) and
    # derive the tile from B so batch-padding waste stays below one tile.
    n_tiles = max(2, pl.cdiv(B, tile_b))
    return _round_up(pl.cdiv(B, n_tiles), 8)


def mlp_forward(x, padded_params, dims_p, out_dim, *, tile_b=1024):
    """x: (B, input_size) f32.  padded_params/dims_p from pad_params()."""
    B, in_dim = x.shape
    assert in_dim == dims_p[0]

    tile_b = _choose_tile_b(B, tile_b)
    Bp = _round_up(B, tile_b)
    if Bp != B:
        x = jnp.pad(x, ((0, Bp - B), (0, 0)))

    grid = (Bp // tile_b,)

    # Input tile: unpadded last dim (== full array dim), f32; cast in-kernel.
    in_specs = [pl.BlockSpec((tile_b, in_dim), lambda i: (i, 0))]
    for li in range(5):
        kp, npad = dims_p[li], dims_p[li + 1]
        in_specs.append(pl.BlockSpec((kp, npad), lambda i: (0, 0)))   # weight: VMEM-resident
        in_specs.append(pl.BlockSpec((1, npad), lambda i: (0, 0)))    # bias:   VMEM-resident
    out_spec = pl.BlockSpec((tile_b, dims_p[-1]), lambda i: (i, 0))   # lane-dense bf16 output

    flops = int(2 * Bp * sum(dims_p[i] * dims_p[i + 1] for i in range(5)))
    bytes_accessed = int(x.size * x.dtype.itemsize
                         + sum(p.size * p.dtype.itemsize for p in padded_params)
                         + Bp * dims_p[-1] * 2)
    cost = pl.CostEstimate(flops=flops,
                           transcendentals=int(Bp * dims_p[-1]),
                           bytes_accessed=bytes_accessed)

    out_padded = pl.pallas_call(
        functools.partial(mlp_kernel, out_dim=out_dim),
        out_shape=jax.ShapeDtypeStruct((Bp, dims_p[-1]), jnp.bfloat16),
        grid=grid,
        in_specs=in_specs,
        out_specs=out_spec,
        compiler_params=pltpu.CompilerParams(dimension_semantics=("parallel",)),
        cost_estimate=cost,
    )(x, *padded_params)

    # Drop batch/lane padding; return f32 like the PyTorch module.
    return out_padded[:B, :out_dim].astype(jnp.float32)


def init_linear(key, fan_in, fan_out):
    # PyTorch-style uniform init with bound 1/sqrt(fan_in).
    kw, kb = jax.random.split(key)
    bound = 1.0 / (fan_in ** 0.5)
    w = jax.random.uniform(kw, (fan_in, fan_out), jnp.float32, -bound, bound)
    b = jax.random.uniform(kb, (fan_out,), jnp.float32, -bound, bound)
    return w, b


def mlp_reference(x, params):
    h = x
    for i, (w, b) in enumerate(params):
        h = h @ w + b
        if i < len(params) - 1:
            h = jnp.maximum(h, 0.0)
    return jax.nn.softmax(h, axis=1)


if __name__ == "__main__":
    # Small shapes consistent with the module's __init__ signature.
    input_size = 32
    dense1_output = 64
    dense2_output = 64
    dense3_output = 48
    dense4_output = 32
    output_size = 16
    batch = 8

    key = jax.random.PRNGKey(0)
    kx, k1, k2, k3, k4, k5 = jax.random.split(key, 6)

    x = jax.random.normal(kx, (batch, input_size), jnp.float32)
    params = [
        init_linear(k1, input_size, dense1_output),
        init_linear(k2, dense1_output, dense2_output),
        init_linear(k3, dense2_output, dense3_output),
        init_linear(k4, dense3_output, dense4_output),
        init_linear(k5, dense4_output, output_size),
    ]

    # One-time padding / bf16 cast of the parameters (hoisted out of the call path).
    padded_params, dims_p = pad_params(params, input_size)

    out = jax.block_until_ready(mlp_forward(x, padded_params, dims_p, output_size))

    # Sanity: shape, softmax rows sum to 1 (bf16 output => small rounding), and
    # close to the f32 pure-JAX reference (bf16 weights/activations in kernel).
    assert out.shape == (batch, output_size)
    assert jnp.allclose(jnp.sum(out, axis=1), 1.0, atol=1e-2), \
        float(jnp.max(jnp.abs(jnp.sum(out, axis=1) - 1.0)))
    ref = mlp_reference(x, params)
    assert jnp.allclose(out, ref, atol=5e-2), float(jnp.max(jnp.abs(out - ref)))

    print("KERNEL_OK")
</pallas_src>

<mosaic_0001>
module attributes {stable_mosaic.version = 11 : i64} {
  func.func @mlp_kernel(%arg0: i32, %arg1: memref<8x32xf32, #tpu.memory_space<vmem>>, %arg2: memref<32x128xbf16, #tpu.memory_space<vmem>>, %arg3: memref<1x128xf32, #tpu.memory_space<vmem>>, %arg4: memref<128x128xbf16, #tpu.memory_space<vmem>>, %arg5: memref<1x128xf32, #tpu.memory_space<vmem>>, %arg6: memref<128x128xbf16, #tpu.memory_space<vmem>>, %arg7: memref<1x128xf32, #tpu.memory_space<vmem>>, %arg8: memref<128x128xbf16, #tpu.memory_space<vmem>>, %arg9: memref<1x128xf32, #tpu.memory_space<vmem>>, %arg10: memref<128x128xbf16, #tpu.memory_space<vmem>>, %arg11: memref<1x128xf32, #tpu.memory_space<vmem>>, %arg12: memref<8x128xbf16, #tpu.memory_space<vmem>>) attributes {dimension_semantics = [#tpu.dimension_semantics<parallel>], iteration_bounds = array<i64: 1>, scalar_prefetch = 0 : i64, scratch_operands = 0 : i64, tpu.core_type = #tpu.core_type<tc>, window_params = [{transform_indices = @transform_0, window_bounds = array<i64: 8, 32>}, {pipeline_mode = #tpu.pipeline_mode<synchronous>, transform_indices = @transform_1, window_bounds = array<i64: 32, 128>}, {pipeline_mode = #tpu.pipeline_mode<synchronous>, transform_indices = @transform_2, window_bounds = array<i64: 1, 128>}, {pipeline_mode = #tpu.pipeline_mode<synchronous>, transform_indices = @transform_3, window_bounds = array<i64: 128, 128>}, {pipeline_mode = #tpu.pipeline_mode<synchronous>, transform_indices = @transform_4, window_bounds = array<i64: 1, 128>}, {pipeline_mode = #tpu.pipeline_mode<synchronous>, transform_indices = @transform_5, window_bounds = array<i64: 128, 128>}, {pipeline_mode = #tpu.pipeline_mode<synchronous>, transform_indices = @transform_6, window_bounds = array<i64: 1, 128>}, {pipeline_mode = #tpu.pipeline_mode<synchronous>, transform_indices = @transform_7, window_bounds = array<i64: 128, 128>}, {pipeline_mode = #tpu.pipeline_mode<synchronous>, transform_indices = @transform_8, window_bounds = array<i64: 1, 128>}, {pipeline_mode = #tpu.pipeline_mode<synchronous>, transform_indices = @transform_9, window_bounds = array<i64: 128, 128>}, {pipeline_mode = #tpu.pipeline_mode<synchronous>, transform_indices = @transform_10, window_bounds = array<i64: 1, 128>}, {transform_indices = @transform_11, window_bounds = array<i64: 8, 128>}]} {
    %c0 = arith.constant 0 : index
    %c0_0 = arith.constant 0 : index
    %0 = vector.load %arg1[%c0, %c0_0] : memref<8x32xf32, #tpu.memory_space<vmem>>, vector<8x32xf32>
    %1 = arith.truncf %0 : vector<8x32xf32> to vector<8x32xbf16>
    %c0_1 = arith.constant 0 : index
    %c0_2 = arith.constant 0 : index
    %2 = vector.load %arg2[%c0_1, %c0_2] : memref<32x128xbf16, #tpu.memory_space<vmem>>, vector<32x128xbf16>
    %cst = arith.constant dense<0.000000e+00> : vector<8x128xf32>
    %3 = tpu.matmul %1, %2, %cst {dimension_numbers = #tpu.dot_dimension_numbers<[1], [0], [0], [1], [0, 0, 1, 1], [], []>} : vector<8x32xbf16>, vector<32x128xbf16>, vector<8x128xf32> -> vector<8x128xf32>
    %c0_3 = arith.constant 0 : index
    %c0_4 = arith.constant 0 : index
    %4 = vector.load %arg3[%c0_3, %c0_4] : memref<1x128xf32, #tpu.memory_space<vmem>>, vector<1x128xf32>
    %5 = vector.broadcast %4 : vector<1x128xf32> to vector<8x128xf32>
    %6 = arith.addf %3, %5 : vector<8x128xf32>
    %cst_5 = arith.constant 0.000000e+00 : f32
    %7 = vector.broadcast %cst_5 : f32 to vector<8x128xf32>
    %8 = arith.maximumf %6, %7 : vector<8x128xf32>
    %9 = arith.truncf %8 : vector<8x128xf32> to vector<8x128xbf16>
    %c0_6 = arith.constant 0 : index
    %c0_7 = arith.constant 0 : index
    %10 = vector.load %arg4[%c0_6, %c0_7] : memref<128x128xbf16, #tpu.memory_space<vmem>>, vector<128x128xbf16>
    %cst_8 = arith.constant dense<0.000000e+00> : vector<8x128xf32>
    %11 = tpu.matmul %9, %10, %cst_8 {dimension_numbers = #tpu.dot_dimension_numbers<[1], [0], [0], [1], [0, 0, 1, 1], [], []>} : vector<8x128xbf16>, vector<128x128xbf16>, vector<8x128xf32> -> vector<8x128xf32>
    %c0_9 = arith.constant 0 : index
    %c0_10 = arith.constant 0 : index
    %12 = vector.load %arg5[%c0_9, %c0_10] : memref<1x128xf32, #tpu.memory_space<vmem>>, vector<1x128xf32>
    %13 = vector.broadcast %12 : vector<1x128xf32> to vector<8x128xf32>
    %14 = arith.addf %11, %13 : vector<8x128xf32>
    %cst_11 = arith.constant 0.000000e+00 : f32
    %15 = vector.broadcast %cst_11 : f32 to vector<8x128xf32>
    %16 = arith.maximumf %14, %15 : vector<8x128xf32>
    %17 = arith.truncf %16 : vector<8x128xf32> to vector<8x128xbf16>
    %c0_12 = arith.constant 0 : index
    %c0_13 = arith.constant 0 : index
    %18 = vector.load %arg6[%c0_12, %c0_13] : memref<128x128xbf16, #tpu.memory_space<vmem>>, vector<128x128xbf16>
    %cst_14 = arith.constant dense<0.000000e+00> : vector<8x128xf32>
    %19 = tpu.matmul %17, %18, %cst_14 {dimension_numbers = #tpu.dot_dimension_numbers<[1], [0], [0], [1], [0, 0, 1, 1], [], []>} : vector<8x128xbf16>, vector<128x128xbf16>, vector<8x128xf32> -> vector<8x128xf32>
    %c0_15 = arith.constant 0 : index
    %c0_16 = arith.constant 0 : index
    %20 = vector.load %arg7[%c0_15, %c0_16] : memref<1x128xf32, #tpu.memory_space<vmem>>, vector<1x128xf32>
    %21 = vector.broadcast %20 : vector<1x128xf32> to vector<8x128xf32>
    %22 = arith.addf %19, %21 : vector<8x128xf32>
    %cst_17 = arith.constant 0.000000e+00 : f32
    %23 = vector.broadcast %cst_17 : f32 to vector<8x128xf32>
    %24 = arith.maximumf %22, %23 : vector<8x128xf32>
    %25 = arith.truncf %24 : vector<8x128xf32> to vector<8x128xbf16>
    %c0_18 = arith.constant 0 : index
    %c0_19 = arith.constant 0 : index
    %26 = vector.load %arg8[%c0_18, %c0_19] : memref<128x128xbf16, #tpu.memory_space<vmem>>, vector<128x128xbf16>
    %cst_20 = arith.constant dense<0.000000e+00> : vector<8x128xf32>
    %27 = tpu.matmul %25, %26, %cst_20 {dimension_numbers = #tpu.dot_dimension_numbers<[1], [0], [0], [1], [0, 0, 1, 1], [], []>} : vector<8x128xbf16>, vector<128x128xbf16>, vector<8x128xf32> -> vector<8x128xf32>
    %c0_21 = arith.constant 0 : index
    %c0_22 = arith.constant 0 : index
    %28 = vector.load %arg9[%c0_21, %c0_22] : memref<1x128xf32, #tpu.memory_space<vmem>>, vector<1x128xf32>
    %29 = vector.broadcast %28 : vector<1x128xf32> to vector<8x128xf32>
    %30 = arith.addf %27, %29 : vector<8x128xf32>
    %cst_23 = arith.constant 0.000000e+00 : f32
    %31 = vector.broadcast %cst_23 : f32 to vector<8x128xf32>
    %32 = arith.maximumf %30, %31 : vector<8x128xf32>
    %33 = arith.truncf %32 : vector<8x128xf32> to vector<8x128xbf16>
    %c0_24 = arith.constant 0 : index
    %c0_25 = arith.constant 0 : index
    %34 = vector.load %arg10[%c0_24, %c0_25] : memref<128x128xbf16, #tpu.memory_space<vmem>>, vector<128x128xbf16>
    %cst_26 = arith.constant dense<0.000000e+00> : vector<8x128xf32>
    %35 = tpu.matmul %33, %34, %cst_26 {dimension_numbers = #tpu.dot_dimension_numbers<[1], [0], [0], [1], [0, 0, 1, 1], [], []>} : vector<8x128xbf16>, vector<128x128xbf16>, vector<8x128xf32> -> vector<8x128xf32>
    %c0_27 = arith.constant 0 : index
    %c0_28 = arith.constant 0 : index
    %36 = vector.load %arg11[%c0_27, %c0_28] : memref<1x128xf32, #tpu.memory_space<vmem>>, vector<1x128xf32>
    %37 = vector.broadcast %36 : vector<1x128xf32> to vector<8x128xf32>
    %38 = arith.addf %35, %37 : vector<8x128xf32>
    %39 = tpu.iota {dimensions = array<i32: 1>} : vector<8x128xi32>
    %c16_i32 = arith.constant 16 : i32
    %40 = vector.broadcast %c16_i32 : i32 to vector<8x128xi32>
    %41 = arith.cmpi slt, %39, %40 : vector<8x128xi32>
    %cst_29 = arith.constant 0xFF800000 : f32
    %42 = vector.broadcast %cst_29 : f32 to vector<8x128xf32>
    %43 = arith.select %41, %38, %42 : vector<8x128xi1>, vector<8x128xf32>
    %cst_30 = arith.constant dense<0xFF800000> : vector<8xf32>
    %44 = vector.multi_reduction <maximumf>, %43, %cst_30 [1] : vector<8x128xf32> to vector<8xf32>
    %45 = vector.shape_cast %44 : vector<8xf32> to vector<8x1xf32>
    %46 = vector.broadcast %45 : vector<8x1xf32> to vector<8x128xf32>
    %47 = arith.subf %43, %46 : vector<8x128xf32>
    %48 = math.exp %47 : vector<8x128xf32>
    %cst_31 = arith.constant dense<0.000000e+00> : vector<8xf32>
    %49 = vector.multi_reduction <add>, %48, %cst_31 [1] : vector<8x128xf32> to vector<8xf32>
    %50 = vector.shape_cast %49 : vector<8xf32> to vector<8x1xf32>
    %51 = vector.broadcast %50 : vector<8x1xf32> to vector<8x128xf32>
    %52 = arith.divf %48, %51 : vector<8x128xf32>
    %53 = arith.truncf %52 : vector<8x128xf32> to vector<8x128xbf16>
    %c0_32 = arith.constant 0 : index
    %c0_33 = arith.constant 0 : index
    %54 = vector.load %arg12[%c0_32, %c0_33] : memref<8x128xbf16, #tpu.memory_space<vmem>>, vector<8x128xbf16>
    tpu.vector_store %arg12[%c0_32, %c0_33], %53 {strides = array<i32>} : memref<8x128xbf16, #tpu.memory_space<vmem>>, vector<8x128xbf16>,
    return
  }
  func.func @transform_0(%arg0: i32) -> (i32, i32) {
    %c0_i32 = arith.constant 0 : i32
    %c0_i32_0 = arith.constant 0 : i32
    return %arg0, %c0_i32 : i32, i32
  }
  func.func @transform_1(%arg0: i32) -> (i32, i32) {
    %c0_i32 = arith.constant 0 : i32
    %c0_i32_0 = arith.constant 0 : i32
    %c0_i32_1 = arith.constant 0 : i32
    return %c0_i32, %c0_i32_0 : i32, i32
  }
  func.func @transform_2(%arg0: i32) -> (i32, i32) {
    %c0_i32 = arith.constant 0 : i32
    %c0_i32_0 = arith.constant 0 : i32
    %c0_i32_1 = arith.constant 0 : i32
    return %c0_i32, %c0_i32_0 : i32, i32
  }
  func.func @transform_3(%arg0: i32) -> (i32, i32) {
    %c0_i32 = arith.constant 0 : i32
    %c0_i32_0 = arith.constant 0 : i32
    %c0_i32_1 = arith.constant 0 : i32
    return %c0_i32, %c0_i32_0 : i32, i32
  }
  func.func @transform_4(%arg0: i32) -> (i32, i32) {
    %c0_i32 = arith.constant 0 : i32
    %c0_i32_0 = arith.constant 0 : i32
    %c0_i32_1 = arith.constant 0 : i32
    return %c0_i32, %c0_i32_0 : i32, i32
  }
  func.func @transform_5(%arg0: i32) -> (i32, i32) {
    %c0_i32 = arith.constant 0 : i32
    %c0_i32_0 = arith.constant 0 : i32
    %c0_i32_1 = arith.constant 0 : i32
    return %c0_i32, %c0_i32_0 : i32, i32
  }
  func.func @transform_6(%arg0: i32) -> (i32, i32) {
    %c0_i32 = arith.constant 0 : i32
    %c0_i32_0 = arith.constant 0 : i32
    %c0_i32_1 = arith.constant 0 : i32
    return %c0_i32, %c0_i32_0 : i32, i32
  }
  func.func @transform_7(%arg0: i32) -> (i32, i32) {
    %c0_i32 = arith.constant 0 : i32
    %c0_i32_0 = arith.constant 0 : i32
    %c0_i32_1 = arith.constant 0 : i32
    return %c0_i32, %c0_i32_0 : i32, i32
  }
  func.func @transform_8(%arg0: i32) -> (i32, i32) {
    %c0_i32 = arith.constant 0 : i32
    %c0_i32_0 = arith.constant 0 : i32
    %c0_i32_1 = arith.constant 0 : i32
    return %c0_i32, %c0_i32_0 : i32, i32
  }
  func.func @transform_9(%arg0: i32) -> (i32, i32) {
    %c0_i32 = arith.constant 0 : i32
    %c0_i32_0 = arith.constant 0 : i32
    %c0_i32_1 = arith.constant 0 : i32
    return %c0_i32, %c0_i32_0 : i32, i32
  }
  func.func @transform_10(%arg0: i32) -> (i32, i32) {
    %c0_i32 = arith.constant 0 : i32
    %c0_i32_0 = arith.constant 0 : i32
    %c0_i32_1 = arith.constant 0 : i32
    return %c0_i32, %c0_i32_0 : i32, i32
  }
  func.func @transform_11(%arg0: i32) -> (i32, i32) {
    %c0_i32 = arith.constant 0 : i32
    %c0_i32_0 = arith.constant 0 : i32
    return %arg0, %c0_i32 : i32, i32
  }
}

</mosaic_0001>

<bundles_post_ra>
// kernel: tpu_custom_call.1
= control target key start
LH: loop header
LB: loop body
LE: loop exit
PB: predicated region body
PF: predicated region fallthrough
CT: control target
= control target key end

     0   :  { %16 = vsyncpa [#allocation3], 0  ;;  %s1038_s0 = inlined_call_operand.hbm [shape: f32[8,32], index: 0, kind: input, shape index: {}]   ;;  %s1039_s1 = inlined_call_operand.hbm [shape: bf16[32,128], index: 1, kind: input, shape index: {}]   ;;  %s1040_s2 = inlined_call_operand.vmem [shape: f32[1,128], index: 2, kind: input, shape index: {}]   ;;  %s1041_s3 = inlined_call_operand.hbm [shape: bf16[128,128], index: 3, kind: input, shape index: {}]   ;;  %s1042_s4 = inlined_call_operand.vmem [shape: f32[1,128], index: 4, kind: input, shape index: {}]   ;;  %s1043_s5 = inlined_call_operand.hbm [shape: bf16[128,128], index: 5, kind: input, shape index: {}]   ;;  %s1044_s6 = inlined_call_operand.vmem [shape: f32[1,128], index: 6, kind: input, shape index: {}]   ;;  %s1045_s7 = inlined_call_operand.hbm [shape: bf16[128,128], index: 7, kind: input, shape index: {}]   ;;  %s1046_s8 = inlined_call_operand.vmem [shape: f32[1,128], index: 8, kind: input, shape index: {}]   ;;  %s1047_s9 = inlined_call_operand.hbm [shape: bf16[128,128], index: 9, kind: input, shape index: {}]   ;;  %s1048_s10 = inlined_call_operand.vmem [shape: f32[1,128], index: 10, kind: input, shape index: {}]   ;;  %s1049_s11 = inlined_call_operand.hbm [shape: bf16[8,128], index: 11, kind: output, shape index: {}]  }
   0x1   :  { %17 = vsyncpa [#allocation6], 0 }
   0x2   :  { %18 = vsyncpa [#allocation9], 0 }
   0x3   :  { %19 = vsyncpa [#allocation12], 0  ;;  %s36_s19 = sshll.u32 %s1039_s1, 4  ;;  %s37_s19 = int_to_ptr.hbm [resolvable:$true] %s36_s19 }
   0x4   :  { %20 = vsyncpa [#allocation4], 0  ;;  %s918_s20 = smov [#allocation5]   ;;  %s66_s24 = sshll.u32 %s1043_s5, 4  ;;  %s67_s24 = int_to_ptr.hbm [resolvable:$true] %s66_s24 }
   0x5   :  { %s38_s21 = sshll.u32 %s918_s20, 4  ;;  %s919_s25 = smov 64   ;;  %s39_s21 = int_to_ptr.vmem [resolvable:$true] %s38_s21 }
   0x6   :  { %s920_s26 = smov 4   ;;  %s921_s27 = smov [#allocation8]  }
   0x7   :  { %44 = dma.hbm_to_vmem [thread:$0]  %s37_s19, 256, %s39_s21, [#allocation6], %s919_s25, %s919_s25, %s920_s26  }
   0x8   :  { %s68_s28 = sshll.u32 %s921_s27, 4  ;;  %s26_s30 = sshll.u32 %s1038_s0, 4  ;;  %s69_s28 = int_to_ptr.vmem [resolvable:$true] %s68_s28  ;;  %s27_s30 = int_to_ptr.hbm [resolvable:$true] %s26_s30 }
   0x9   :  { %74 = dma.hbm_to_vmem [thread:$0]  %s67_s24, 1024, %s69_s28, [#allocation9], %s919_s25, %s919_s25, %s920_s26  }
   0xa   :  { %s51_s13 = sshll.u32 %s1041_s3, 4  ;;  %s922_s14 = smov [#allocation2]   ;;  %s52_s13 = int_to_ptr.hbm [resolvable:$true] %s51_s13 }
   0xb   :  { %s28_s15 = sshll.u32 %s922_s14, 4  ;;  %s923_s16 = smov [#allocation7]   ;;  %s29_s15 = int_to_ptr.vmem [resolvable:$true] %s28_s15 }
   0xc   :  { %31 = dma.hbm_to_vmem [thread:$0]  %s27_s30, 128, %s29_s15, [#allocation3]  }
   0xd   :  { %s53_s17 = sshll.u32 %s923_s16, 4  ;;  %s81_s0 = sshll.u32 %s1045_s7, 4  ;;  %s54_s17 = int_to_ptr.vmem [resolvable:$true] %s53_s17  ;;  %s82_s0 = int_to_ptr.hbm [resolvable:$true] %s81_s0 }
   0xe   :  { %59 = dma.hbm_to_vmem [thread:$0]  %s52_s13, 1024, %s54_s17, [#allocation6], %s919_s25, %s919_s25, %s920_s26  }
   0xf   :  { %s96_s3 = sshll.u32 %s1047_s9, 4  ;;  %s924_s22 = smov [#allocation10]   ;;  %s97_s3 = int_to_ptr.hbm [resolvable:$true] %s96_s3 }
  0x10   :  { %s83_s23 = sshll.u32 %s924_s22, 4  ;;  %s925_s24 = smov [#allocation11]   ;;  %s84_s23 = int_to_ptr.vmem [resolvable:$true] %s83_s23 }
  0x11   :  { %89 = dma.hbm_to_vmem [thread:$0]  %s82_s0, 1024, %s84_s23, [#allocation9], %s919_s25, %s919_s25, %s920_s26  }
  0x12   :  { %s98_s7 = sshll.u32 %s925_s24, 4  ;;  %s99_s7 = int_to_ptr.vmem [resolvable:$true] %s98_s7 }
  0x13   :  { %104 = dma.hbm_to_vmem [thread:$0]  %s97_s3, 1024, %s99_s7, [#allocation12], %s919_s25, %s919_s25, %s920_s26  }
  0x14   :  { %908 = dma.done.wait [#allocation3], 128  }
  0x15   :  { %909 = vsyncadd [#allocation3], 4294967168 }
  0x16   :  { %910 = dma.done.wait [#allocation6], 1280  }
  0x17   :  { %911 = vsyncadd [#allocation6], 4294966016 }
  0x18   :  { %912 = dma.done.wait [#allocation9], 2048  }
  0x19   :  { %913 = vsyncadd [#allocation9], 4294965248 }
  0x1a   :  { %914 = dma.done.wait [#allocation12], 1024  }
  0x1b   :  { %915 = vsyncadd [#allocation12], 4294966272  ;;  %v689_v0 = vld [vmem:[#allocation5 + $0x8] sm:$0xff]  ;;  %v688_v2 = vld [vmem:[#allocation5] sm:$0xff]  ;;  %vm154_vm0 = vcmask 261120   ;;  %v503_v60 = vlaneseq  ;;  %s538_s12 = sshll.u32 %s1049_s11, 4  ;;  %s539_s12 = int_to_ptr.hbm [resolvable:$true] %s538_s12 }
  0x1c   :  { %v697_v1 = vld [vmem:[#allocation7 + $0x38] sm:$0xff]  ;;  %164 = vmatpush.bf16.msra.mxu0 %v689_v0  ;;  %v132_v3 = vld [vmem:[#allocation2] sm:$0xff]  ;;  %v696_v4 = vld [vmem:[#allocation7 + $0x30] sm:$0xff] }
  0x1d   :  { %241 = vmatpush.bf16.msra.mxu1 %v697_v1  ;;  %v133_v5 = vpack.c.bf16 %v132_v3, %v132_v3  ;;  %v695_v6 = vld [vmem:[#allocation7 + $0x28] sm:$0xff]  ;;  %v694_v7 = vld [vmem:[#allocation7 + $0x20] sm:$0xff]  ;;  %v693_v8 = vld [vmem:[#allocation7 + $0x18] sm:$0xff]  ;;  %v504_v61 = vand.u32 127, %v503_v60 }
  0x1e   :  { %v692_v9 = vld [vmem:[#allocation7 + $0x10] sm:$0xff]  ;;  %v691_v10 = vld [vmem:[#allocation7 + $0x8] sm:$0xff]  ;;  %v690_v11 = vld [vmem:[#allocation7] sm:$0xff] }
  0x1f   :  { %v705_v12 = vld [vmem:[#allocation8 + $0x38] sm:$0xff]  ;;  %v704_v13 = vld [vmem:[#allocation8 + $0x30] sm:$0xff]  ;;  %v703_v14 = vld [vmem:[#allocation8 + $0x28] sm:$0xff]  ;;  %vm505_vm1 = vcmp.lt.s32.totalorder %v504_v61, 16 }
  0x20   :  { %165 = vmatpush.bf16.msra.mxu0 %v688_v2  ;;  %324 = vmatpush.bf16.msra.mxu2 %v705_v12  ;;  %v702_v15 = vld [vmem:[#allocation8 + $0x20] sm:$0xff]  ;;  %v701_v16 = vld [vmem:[#allocation8 + $0x18] sm:$0xff]  ;;  %v700_v17 = vld [vmem:[#allocation8 + $0x10] sm:$0xff] }
  0x21   :  { %242 = vmatpush.bf16.msra.mxu1 %v696_v4  ;;  %v731_v18 = vld [vmem:[%s1040_s2] ss:$0 sm:$0xff]  ;;  %v698_v25 = vld [vmem:[#allocation8] sm:$0xff]  ;;  %v713_v26 = vld [vmem:[#allocation10 + $0x38] sm:$0xff] }
  0x22   :  { %v699_v24 = vld [vmem:[#allocation8 + $0x8] sm:$0xff]  ;;  %407 = vmatpush.bf16.msra.mxu3 %v713_v26  ;;  %v712_v27 = vld [vmem:[#allocation10 + $0x30] sm:$0xff]  ;;  %v710_v29 = vld [vmem:[#allocation10 + $0x20] sm:$0xff] }
  0x23   :  { %559 = vmatmul.msk.bf16.vlgmr.msra.gmra.mxu0 %vm154_vm0, %v133_v5  ;;  %v711_v28 = vld [vmem:[#allocation10 + $0x28] sm:$0xff]  ;;  %v709_v30 = vld [vmem:[#allocation10 + $0x18] sm:$0xff]  ;;  %v708_v31 = vld [vmem:[#allocation10 + $0x10] sm:$0xff] }
  0x24   :  { %325 = vmatpush.bf16.msra.mxu2 %v704_v13  ;;  %v732_v32 = vld [vmem:[%s1042_s4] ss:$0 sm:$0xff]  ;;  %v706_v39 = vld [vmem:[#allocation10] sm:$0xff]  ;;  %v721_v40 = vld [vmem:[#allocation11 + $0x38] sm:$0xff] }
  0x25   :  { %243 = vmatpush.bf16.msra.mxu1 %v695_v6  ;;  %v707_v38 = vld [vmem:[#allocation10 + $0x8] sm:$0xff]  ;;  %490 = vmatpush.bf16.msrb.mxu0 %v721_v40  ;;  %v720_v41 = vld [vmem:[#allocation11 + $0x30] sm:$0xff]  ;;  %v718_v43 = vld [vmem:[#allocation11 + $0x20] sm:$0xff] }
  0x26   :  { %408 = vmatpush.bf16.msra.mxu3 %v712_v27  ;;  %v719_v42 = vld [vmem:[#allocation11 + $0x28] sm:$0xff]  ;;  %v717_v44 = vld [vmem:[#allocation11 + $0x18] sm:$0xff]  ;;  %v716_v45 = vld [vmem:[#allocation11 + $0x10] sm:$0xff] }
  0x27   :  { %v733_v46 = vld [vmem:[%s1044_s6] ss:$0 sm:$0xff]  ;;  %v714_v53 = vld [vmem:[#allocation11] sm:$0xff] }
  0x28   :  { %326 = vmatpush.bf16.msra.mxu2 %v703_v14  ;;  %v715_v52 = vld [vmem:[#allocation11 + $0x8] sm:$0xff] }
  0x29   :  { %244 = vmatpush.bf16.msra.mxu1 %v694_v7  ;;  %491 = vmatpush.bf16.msrb.mxu0 %v720_v41  ;;  %v734_v54 = vld [vmem:[%s1046_s8] ss:$0 sm:$0xff]  ;;  %s926_s8 = smov [#allocation13]  }
  0x2a   :  { %409 = vmatpush.bf16.msra.mxu3 %v711_v28  ;;  %v735_v62 = vld [vmem:[%s1048_s10] ss:$0 sm:$0xff]  ;;  %s536_s10 = sshll.u32 %s926_s8, 4  ;;  %s537_s10 = int_to_ptr.vmem [resolvable:$true] %s536_s10 }
  0x2c   :  { %327 = vmatpush.bf16.msra.mxu2 %v702_v15 }
  0x2d   :  { %245 = vmatpush.bf16.msra.mxu1 %v693_v8  ;;  %492 = vmatpush.bf16.msrb.mxu0 %v719_v42 }
  0x2e   :  { %410 = vmatpush.bf16.msra.mxu3 %v710_v29 }
  0x30   :  { %328 = vmatpush.bf16.msra.mxu2 %v701_v16 }
  0x31   :  { %246 = vmatpush.bf16.msra.mxu1 %v692_v9  ;;  %493 = vmatpush.bf16.msrb.mxu0 %v718_v43 }
  0x32   :  { %411 = vmatpush.bf16.msra.mxu3 %v709_v30 }
  0x34   :  { %329 = vmatpush.bf16.msra.mxu2 %v700_v17 }
  0x35   :  { %247 = vmatpush.bf16.msra.mxu1 %v691_v10  ;;  %494 = vmatpush.bf16.msrb.mxu0 %v717_v44 }
  0x36   :  { %412 = vmatpush.bf16.msra.mxu3 %v708_v31 }
  0x38   :  { %330 = vmatpush.bf16.msra.mxu2 %v699_v24 }
  0x39   :  { %248 = vmatpush.bf16.msra.mxu1 %v690_v11  ;;  %495 = vmatpush.bf16.msrb.mxu0 %v716_v45 }
  0x3a   :  { %413 = vmatpush.bf16.msra.mxu3 %v707_v38 }
  0x3c   :  { %331 = vmatpush.bf16.msra.mxu2 %v698_v25 }
  0x3d   :  { %496 = vmatpush.bf16.msrb.mxu0 %v715_v52 }
  0x3e   :  { %414 = vmatpush.bf16.msra.mxu3 %v706_v39 }
  0x41   :  { %497 = vmatpush.bf16.msrb.mxu0 %v714_v53 }
  0xa0   :  { %v167_v19 = vpop.f32.mrf.mxu0 }
  0xa1   :  { %v168_v20 = vadd.f32 %v731_v18, %v167_v19 }
  0xa3   :  { %v171_v21 = vmax.f32 %v168_v20, 0.0 }
  0xa5   :  { %v172_v22 = vpack.c.bf16 %v171_v21, %v171_v21 }
  0xa7   :  { %249 = vmatmul.bf16.vlgmr.msra.gmra.mxu1 %v172_v22 }
  0xa8   :  { %v169_v23 = vpop.f32.mrf.mxu0 }
 0x124   :  { %v250_v33 = vpop.f32.mrf.mxu1 }
 0x125   :  { %v251_v34 = vadd.f32 %v732_v32, %v250_v33 }
 0x127   :  { %v254_v35 = vmax.f32 %v251_v34, 0.0 }
 0x129   :  { %v255_v36 = vpack.c.bf16 %v254_v35, %v254_v35 }
 0x12b   :  { %332 = vmatmul.bf16.vlgmr.msra.gmra.mxu2 %v255_v36 }
 0x12c   :  { %v252_v37 = vpop.f32.mrf.mxu1 }
 0x1ae   :  { %v333_v47 = vpop.f32.mrf.mxu2 }
 0x1af   :  { %v334_v48 = vadd.f32 %v733_v46, %v333_v47 }
 0x1b1   :  { %v337_v49 = vmax.f32 %v334_v48, 0.0 }
 0x1b3   :  { %v338_v50 = vpack.c.bf16 %v337_v49, %v337_v49 }
 0x1b5   :  { %415 = vmatmul.bf16.vlgmr.msra.gmra.mxu3 %v338_v50 }
 0x1b6   :  { %v335_v51 = vpop.f32.mrf.mxu2 }
 0x238   :  { %v416_v55 = vpop.f32.mrf.mxu3 }
 0x239   :  { %v417_v56 = vadd.f32 %v734_v54, %v416_v55 }
 0x23b   :  { %v420_v57 = vmax.f32 %v417_v56, 0.0 }
 0x23d   :  { %v421_v58 = vpack.c.bf16 %v420_v57, %v420_v57 }
 0x23f   :  { %498 = vmatmul.bf16.vlgmr.msrb.gmra.mxu0 %v421_v58 }
 0x240   :  { %v418_v59 = vpop.f32.mrf.mxu3 }
 0x2bc   :  { %v499_v63 = vpop.f32.mrf.mxu0 }
 0x2bd   :  { %v500_v0 = vadd.f32 %v735_v62, %v499_v63 }
 0x2bf   :  { %v506_v1 = vsel %vm505_vm1, %v500_v0, -inf }
 0x2c0   :  { %507 = vmax.xlane.f32.xlu0 %v506_v1 }
 0x2c4   :  { %v501_v2 = vpop.f32.mrf.mxu0 }
 0x333   :  { %v508_v3 = vpop.xlane.xlu0 %507 }
 0x334   :  { %v509_v4 = vsub.f32 %v506_v1, %v508_v3 }
 0x336   :  { %v510_v5 = vmul.f32 1.442695, %v509_v4 }
 0x338   :  { %736 = vpow2.f32 %v510_v5 }
 0x33e   :  { %v737_v6 = vpop.eup %736 }
 0x33f   :  { %512 = vadd.xlane.f32.xlu0 %v737_v6 }
 0x3b2   :  { %v513_v7 = vpop.xlane.xlu0 %512 }
 0x3b3   :  { %738 = vrcp.f32 %v513_v7  ;;  %v525_v11 = vand.u32 2147483648, %v513_v7  ;;  %v523_v13 = vand.u32 2147483647, %v513_v7  ;;  %vm519_vm3 = vweird.f32 %v513_v7 }
 0x3b5   :  { %v526_v15 = vor.u32 1.1754944e-38, %v525_v11  ;;  %vm524_vm5 = vcmp.eq.f32.partialorder %v523_v13, 8.507059e+37 }
 0x3b9   :  { %v739_v8 = vpop.eup %738 }
 0x3ba   :  { %v515_v9 = vmul.f32 %v739_v8, %v513_v7  ;;  %vm520_vm2 = vweird.f32 %v739_v8 }
 0x3bb   :  { %vm521_vm4 = vmor %vm519_vm3, %vm520_vm2 }
 0x3bc   :  { %v516_v10 = vsub.f32 1.0, %v515_v9 }
 0x3be   :  { %v517_v12 = vmul.f32 %v739_v8, %v516_v10 }
 0x3c0   :  { %v518_v14 = vadd.f32 %v739_v8, %v517_v12 }
 0x3c2   :  { %v522_v16 = vsel %vm521_vm4, %v739_v8, %v518_v14 }
 0x3c3   :  { %v527_v17 = vsel %vm524_vm5, %v526_v15, %v522_v16 }
 0x3c4   :  { %v528_v18 = vmul.f32 %v737_v6, %v527_v17 }
 0x3c6   :  { %v529_v19 = vpack.c.bf16 %v528_v18, %v528_v18 }
 0x3c8   :  { %530 = vst [vmem:[#allocation13] sm:$0xf] %v529_v19 }
 0x3c9   :  { %541 = dma.vmem_to_hbm [thread:$0]  %s537_s10, 64, %s539_s12, [#allocation4]  }
 0x3ca   :  { %916 = dma.done.wait [#allocation4], 64  }
 0x3cb   :  { %917 = vsyncadd [#allocation4], 4294967232 }
 0x3cc   :  { %546 = vsyncpa [#allocation3], 1 }
 0x3cd   :  { %547 = vsyncpa [#allocation6], 1 }
 0x3ce   :  { %548 = vsyncpa [#allocation9], 1 }
 0x3cf   :  { %549 = vsyncpa [#allocation12], 1 }
 0x3d0   :  { %550 = vsyncpa [#allocation4], 1 }

</bundles_post_ra>
